<compile_context>
chip_gen: v6e
topology: v6e:2x2x1
jax: 0.10.0
libtpu: 0.0.40
codegen_flags: <defaults>
</compile_context>

<pallas_src>
import jax
import jax.numpy as jnp
from jax.experimental import pallas as pl
from jax.experimental.pallas import tpu as pltpu


def _round_up(a: int, b: int) -> int:
    return (a + b - 1) // b * b


def _lane_pad(n: int) -> int:
    """Pad a lane (last) dim to a 128 multiple only when the overhead is small
    (<=12.5%).  For small op_dim the masked-store penalty is far cheaper than
    8x inflated output HBM traffic plus the slice-back copy."""
    if n % 128 == 0:
        return n
    p = _round_up(n, 128)
    return p if (n >= 128 and (p - n) * 8 <= p) else n


def _fit_tm(tm: int, ip_dim: int, hid: int, n_out: int,
            xb: int, mb: int, ob: int, budget: int = 40 << 20) -> int:
    """Shrink the row tile until the per-step VMEM footprint (double-buffered
    x/out tiles + single-buffered weights + f32 intermediates) fits the budget.
    Matters on v7x (64 MiB physical VMEM, 32 MiB default scoped limit)."""
    weights = ip_dim * hid * mb + hid * n_out * mb + (hid + n_out) * 4
    while tm > 8:
        tiles = 2 * tm * ip_dim * xb + 2 * tm * n_out * ob
        interm = tm * hid * (4 + mb) + tm * n_out * 4
        if weights + tiles + interm <= budget:
            break
        tm = max(8, _round_up(tm // 2, 8))
    return tm


def _mlp_kernel(x_ref, w1_ref, b1_ref, w2_ref, b2_ref, o_ref):
    # x_ref: (tm, ip_dim)   w1_ref: (ip_dim, hid)  b1_ref: (1, hid)
    # w2_ref: (hid, n_out)  b2_ref: (1, n_out)     o_ref: (tm, n_out)
    x = x_ref[...].astype(w1_ref.dtype)                    # in-kernel cast to MXU dtype
    h = jnp.dot(x, w1_ref[...], preferred_element_type=jnp.float32)
    h = jnp.maximum(h + b1_ref[...], 0.0)                  # bias + ReLU in f32 (VPU filler)
    h = h.astype(w2_ref.dtype)                             # matched MXU operands
    out = jnp.dot(h, w2_ref[...], preferred_element_type=jnp.float32)
    o_ref[...] = (out + b2_ref[...]).astype(o_ref.dtype)


def prepare_params(w1, b1, w2, b2, *, mxu_dtype=None):
    """One-time weight prep (cast + bias reshape + optional output lane pad).

    Hoisted out of the per-call path so it is not re-done every forward.
    w1: (ip_dim, hid)  b1: (hid,)  w2: (hid, op_dim)  b2: (op_dim,)
    """
    ip_dim, hid = w1.shape
    hid2, op_dim = w2.shape
    assert hid2 == hid, "w1/w2 inner dims mismatch"

    cdt = mxu_dtype
    if cdt is None:
        # bf16 MXU operands by default for f32 params (v6e/v7x-native; halves
        # weight DMA bytes).  Accumulation/epilogue stay f32 in the kernel.
        cdt = jnp.bfloat16 if w1.dtype == jnp.float32 else w1.dtype

    n_out = _lane_pad(op_dim)
    w1c = w1.astype(cdt)
    b1c = b1.astype(jnp.float32).reshape(1, hid)
    if n_out != op_dim:  # zero-pad is exact: padded columns produce 0 + 0 bias
        w2c = jnp.zeros((hid, n_out), cdt).at[:, :op_dim].set(w2.astype(cdt))
        b2c = jnp.zeros((1, n_out), jnp.float32).at[0, :op_dim].set(
            b2.astype(jnp.float32))
    else:
        w2c = w2.astype(cdt)
        b2c = b2.astype(jnp.float32).reshape(1, n_out)

    return dict(w1=w1c, b1=b1c, w2=w2c, b2=b2c,
                ip_dim=ip_dim, hid=hid, op_dim=op_dim, n_out=n_out)


def feed_frwd_net_apply(params, x, *, tm=1024):
    """Forward pass of FeedFrwdNet (matches PyTorch input.view(-1, ip_dim))."""
    ip_dim, hid = params["ip_dim"], params["hid"]
    op_dim, n_out = params["op_dim"], params["n_out"]
    w1, b1, w2, b2 = params["w1"], params["b1"], params["w2"], params["b2"]

    x2 = x.reshape(-1, ip_dim)               # == input.view(-1, ip_dim)
    M = x2.shape[0]
    out_dtype = x2.dtype

    xb = jnp.dtype(x2.dtype).itemsize
    mb = jnp.dtype(w1.dtype).itemsize
    ob = jnp.dtype(out_dtype).itemsize

    # Row tile: large by default; shrunk for small M / VMEM pressure.
    tm_eff = min(tm, _round_up(M, 8))
    tm_eff = _fit_tm(tm_eff, ip_dim, hid, n_out, xb, mb, ob)
    # Prefer >=4 grid steps for large M (two v7x TCs shard the parallel axis and
    # each still gets pipeline overlap), but never shrink below 256 rows
    # (mem-bound HBM utilization plateaus at 512-1024-row tiles).
    while tm_eff > 256 and pl.cdiv(M, tm_eff) < 4:
        tm_eff = max(256, _round_up(tm_eff // 2, 8))

    grid = (pl.cdiv(M, tm_eff),)

    # Explicit scoped-VMEM limit with headroom (default is only 16/32/32 MiB
    # on v5e/v6e/v7x); capped at v7x's 64 MiB physical.
    vmem_est = (2 * tm_eff * ip_dim * xb + 2 * tm_eff * n_out * ob
                + ip_dim * hid * mb + hid * n_out * mb + (hid + n_out) * 4
                + tm_eff * hid * (4 + mb) + tm_eff * n_out * 4)
    vmem_limit = int(min(64 << 20, max(16 << 20, 2 * vmem_est)))

    cost = pl.CostEstimate(
        flops=2 * M * (ip_dim * hid + hid * n_out),
        transcendentals=0,
        bytes_accessed=(M * ip_dim * xb + ip_dim * hid * mb
                        + hid * n_out * mb + (hid + n_out) * 4
                        + M * n_out * ob),
    )

    def _run(weight_mode):
        kw = {} if weight_mode is None else dict(pipeline_mode=weight_mode)
        return pl.pallas_call(
            _mlp_kernel,
            out_shape=jax.ShapeDtypeStruct((M, n_out), out_dtype),
            grid_spec=pltpu.PrefetchScalarGridSpec(
                num_scalar_prefetch=0,
                grid=grid,
                in_specs=[
                    pl.BlockSpec((tm_eff, ip_dim), lambda i: (i, 0)),   # x rows
                    pl.BlockSpec((ip_dim, hid), lambda i: (0, 0), **kw),  # w1
                    pl.BlockSpec((1, hid), lambda i: (0, 0), **kw),       # b1
                    pl.BlockSpec((hid, n_out), lambda i: (0, 0), **kw),   # w2
                    pl.BlockSpec((1, n_out), lambda i: (0, 0), **kw),     # b2
                ],
                out_specs=pl.BlockSpec((tm_eff, n_out), lambda i: (i, 0)),
            ),
            compiler_params=pltpu.CompilerParams(
                dimension_semantics=("parallel",),
                vmem_limit_bytes=vmem_limit,
            ),
            cost_estimate=cost,
        )(x2, w1, b1, w2, b2)

    try:
        # Weights/biases never change across the row grid: single-buffer them so
        # their resident VMEM footprint is not doubled (matters most on v7x).
        out = _run(pl.Buffered(1))
    except Exception:  # pragma: no cover - jax versions w/o pipeline_mode support
        out = _run(None)

    if n_out != op_dim:
        out = out[:, :op_dim]
    return out


def feed_frwd_net(x, w1, b1, w2, b2, *, mxu_dtype=None, tm=1024):
    """One-shot convenience wrapper (prepare + apply).  For repeated forwards,
    call prepare_params() once and reuse feed_frwd_net_apply()."""
    return feed_frwd_net_apply(
        prepare_params(w1, b1, w2, b2, mxu_dtype=mxu_dtype), x, tm=tm)


if __name__ == "__main__":
    # Small shapes implied by forward(): input flattens to (-1, ip_dim).
    ip_dim, hid_nrn, op_dim = 32, 64, 16
    batch, extra = 2, 4                     # input (2, 4, 32) -> view(-1, 32) == (8, 32)

    key = jax.random.PRNGKey(0)
    kx, k1, k2, k3, k4, kx2 = jax.random.split(key, 6)

    x = jax.random.normal(kx, (batch, extra, ip_dim), dtype=jnp.float32)

    # Deterministic parameter init (uniform, like PyTorch Linear's default range).
    lim1 = 1.0 / (ip_dim ** 0.5)
    lim2 = 1.0 / (hid_nrn ** 0.5)
    w1 = jax.random.uniform(k1, (ip_dim, hid_nrn), jnp.float32, -lim1, lim1)
    b1 = jax.random.uniform(k2, (hid_nrn,), jnp.float32, -lim1, lim1)
    w2 = jax.random.uniform(k3, (hid_nrn, op_dim), jnp.float32, -lim2, lim2)
    b2 = jax.random.uniform(k4, (op_dim,), jnp.float32, -lim2, lim2)

    # Reference in plain JAX.
    def ref_fn(xin):
        x2 = xin.reshape(-1, ip_dim)
        return jnp.maximum(x2 @ w1 + b1, 0.0) @ w2 + b2

    ref = ref_fn(x)

    # 1) Exact-semantics check: f32 MXU operands, tight tolerance.
    params_f32 = prepare_params(w1, b1, w2, b2, mxu_dtype=jnp.float32)
    out_f32 = jax.block_until_ready(feed_frwd_net_apply(params_f32, x))
    assert out_f32.shape == (batch * extra, op_dim)
    assert jnp.allclose(out_f32, ref, atol=1e-5, rtol=1e-5), "f32 mismatch vs reference"

    # 2) Default fast path: bf16 MXU operands, f32 accumulation (v6e/v7x native).
    params = prepare_params(w1, b1, w2, b2)         # hoisted, reused across calls
    out_bf16 = jax.block_until_ready(feed_frwd_net_apply(params, x))
    assert jnp.allclose(out_bf16, ref, atol=2e-2, rtol=2e-2), "bf16 mismatch"

    # 3) Ragged batch (M=15) exercises the grid-remainder path (no HBM padding).
    x_odd = jax.random.normal(kx2, (3, 5, ip_dim), dtype=jnp.float32)
    out_odd = jax.block_until_ready(feed_frwd_net_apply(params_f32, x_odd))
    assert out_odd.shape == (15, op_dim)
    assert jnp.allclose(out_odd, ref_fn(x_odd), atol=1e-5, rtol=1e-5), "ragged mismatch"

    # 4) One-shot convenience wrapper matches the prepared path.
    out_once = jax.block_until_ready(feed_frwd_net(x, w1, b1, w2, b2))
    assert jnp.allclose(out_once, out_bf16, atol=1e-6, rtol=1e-6), "wrapper mismatch"

    print("KERNEL_OK")
</pallas_src>

<mosaic_0001>
module attributes {stable_mosaic.version = 11 : i64} {
  func.func @_mlp_kernel(%arg0: i32, %arg1: memref<8x32xf32, #tpu.memory_space<vmem>>, %arg2: memref<32x64xf32, #tpu.memory_space<vmem>>, %arg3: memref<1x64xf32, #tpu.memory_space<vmem>>, %arg4: memref<64x16xf32, #tpu.memory_space<vmem>>, %arg5: memref<1x16xf32, #tpu.memory_space<vmem>>, %arg6: memref<8x16xf32, #tpu.memory_space<vmem>>) attributes {dimension_semantics = [#tpu.dimension_semantics<parallel>], iteration_bounds = array<i64: 1>, scalar_prefetch = 0 : i64, scratch_operands = 0 : i64, tpu.core_type = #tpu.core_type<tc>, window_params = [{transform_indices = @transform_0, window_bounds = array<i64: 8, 32>}, {pipeline_mode = #tpu.pipeline_mode<synchronous>, transform_indices = @transform_1, window_bounds = array<i64: 32, 64>}, {pipeline_mode = #tpu.pipeline_mode<synchronous>, transform_indices = @transform_2, window_bounds = array<i64: 1, 64>}, {pipeline_mode = #tpu.pipeline_mode<synchronous>, transform_indices = @transform_3, window_bounds = array<i64: 64, 16>}, {pipeline_mode = #tpu.pipeline_mode<synchronous>, transform_indices = @transform_4, window_bounds = array<i64: 1, 16>}, {transform_indices = @transform_5, window_bounds = array<i64: 8, 16>}]} {
    %c0 = arith.constant 0 : index
    %c0_0 = arith.constant 0 : index
    %0 = vector.load %arg1[%c0, %c0_0] : memref<8x32xf32, #tpu.memory_space<vmem>>, vector<8x32xf32>
    %c0_1 = arith.constant 0 : index
    %c0_2 = arith.constant 0 : index
    %1 = vector.load %arg2[%c0_1, %c0_2] : memref<32x64xf32, #tpu.memory_space<vmem>>, vector<32x64xf32>
    %cst = arith.constant dense<0.000000e+00> : vector<8x64xf32>
    %2 = tpu.matmul %0, %1, %cst {dimension_numbers = #tpu.dot_dimension_numbers<[1], [0], [0], [1], [0, 0, 1, 1], [], []>} : vector<8x32xf32>, vector<32x64xf32>, vector<8x64xf32> -> vector<8x64xf32>
    %c0_3 = arith.constant 0 : index
    %c0_4 = arith.constant 0 : index
    %3 = vector.load %arg3[%c0_3, %c0_4] : memref<1x64xf32, #tpu.memory_space<vmem>>, vector<1x64xf32>
    %4 = vector.broadcast %3 : vector<1x64xf32> to vector<8x64xf32>
    %5 = arith.addf %2, %4 : vector<8x64xf32>
    %cst_5 = arith.constant 0.000000e+00 : f32
    %6 = vector.broadcast %cst_5 : f32 to vector<8x64xf32>
    %7 = arith.maximumf %5, %6 : vector<8x64xf32>
    %c0_6 = arith.constant 0 : index
    %c0_7 = arith.constant 0 : index
    %8 = vector.load %arg4[%c0_6, %c0_7] : memref<64x16xf32, #tpu.memory_space<vmem>>, vector<64x16xf32>
    %cst_8 = arith.constant dense<0.000000e+00> : vector<8x16xf32>
    %9 = tpu.matmul %7, %8, %cst_8 {dimension_numbers = #tpu.dot_dimension_numbers<[1], [0], [0], [1], [0, 0, 1, 1], [], []>} : vector<8x64xf32>, vector<64x16xf32>, vector<8x16xf32> -> vector<8x16xf32>
    %c0_9 = arith.constant 0 : index
    %c0_10 = arith.constant 0 : index
    %10 = vector.load %arg5[%c0_9, %c0_10] : memref<1x16xf32, #tpu.memory_space<vmem>>, vector<1x16xf32>
    %11 = vector.broadcast %10 : vector<1x16xf32> to vector<8x16xf32>
    %12 = arith.addf %9, %11 : vector<8x16xf32>
    %c0_11 = arith.constant 0 : index
    %c0_12 = arith.constant 0 : index
    %13 = vector.load %arg6[%c0_11, %c0_12] : memref<8x16xf32, #tpu.memory_space<vmem>>, vector<8x16xf32>
    tpu.vector_store %arg6[%c0_11, %c0_12], %12 {strides = array<i32>} : memref<8x16xf32, #tpu.memory_space<vmem>>, vector<8x16xf32>,
    return
  }
  func.func @transform_0(%arg0: i32) -> (i32, i32) {
    %c0_i32 = arith.constant 0 : i32
    %c0_i32_0 = arith.constant 0 : i32
    return %arg0, %c0_i32 : i32, i32
  }
  func.func @transform_1(%arg0: i32) -> (i32, i32) {
    %c0_i32 = arith.constant 0 : i32
    %c0_i32_0 = arith.constant 0 : i32
    %c0_i32_1 = arith.constant 0 : i32
    return %c0_i32, %c0_i32_0 : i32, i32
  }
  func.func @transform_2(%arg0: i32) -> (i32, i32) {
    %c0_i32 = arith.constant 0 : i32
    %c0_i32_0 = arith.constant 0 : i32
    %c0_i32_1 = arith.constant 0 : i32
    return %c0_i32, %c0_i32_0 : i32, i32
  }
  func.func @transform_3(%arg0: i32) -> (i32, i32) {
    %c0_i32 = arith.constant 0 : i32
    %c0_i32_0 = arith.constant 0 : i32
    %c0_i32_1 = arith.constant 0 : i32
    return %c0_i32, %c0_i32_0 : i32, i32
  }
  func.func @transform_4(%arg0: i32) -> (i32, i32) {
    %c0_i32 = arith.constant 0 : i32
    %c0_i32_0 = arith.constant 0 : i32
    %c0_i32_1 = arith.constant 0 : i32
    return %c0_i32, %c0_i32_0 : i32, i32
  }
  func.func @transform_5(%arg0: i32) -> (i32, i32) {
    %c0_i32 = arith.constant 0 : i32
    %c0_i32_0 = arith.constant 0 : i32
    return %arg0, %c0_i32 : i32, i32
  }
}

module attributes {stable_mosaic.version = 11 : i64} {
  func.func @_mlp_kernel(%arg0: i32, %arg1: memref<8x32xf32, #tpu.memory_space<vmem>>, %arg2: memref<32x64xf32, #tpu.memory_space<vmem>>, %arg3: memref<1x64xf32, #tpu.memory_space<vmem>>, %arg4: memref<64x16xf32, #tpu.memory_space<vmem>>, %arg5: memref<1x16xf32, #tpu.memory_space<vmem>>, %arg6: memref<8x16xf32, #tpu.memory_space<vmem>>) attributes {dimension_semantics = [#tpu.dimension_semantics<parallel>], iteration_bounds = array<i64: 1>, scalar_prefetch = 0 : i64, scratch_operands = 0 : i64, tpu.core_type = #tpu.core_type<tc>, window_params = [{transform_indices = @transform_0, window_bounds = array<i64: 8, 32>}, {pipeline_mode = #tpu.pipeline_mode<synchronous>, transform_indices = @transform_1, window_bounds = array<i64: 32, 64>}, {pipeline_mode = #tpu.pipeline_mode<synchronous>, transform_indices = @transform_2, window_bounds = array<i64: 1, 64>}, {pipeline_mode = #tpu.pipeline_mode<synchronous>, transform_indices = @transform_3, window_bounds = array<i64: 64, 16>}, {pipeline_mode = #tpu.pipeline_mode<synchronous>, transform_indices = @transform_4, window_bounds = array<i64: 1, 16>}, {transform_indices = @transform_5, window_bounds = array<i64: 8, 16>}]} {
    %c0 = arith.constant 0 : index
    %c0_0 = arith.constant 0 : index
    %0 = vector.load %arg1[%c0, %c0_0] : memref<8x32xf32, #tpu.memory_space<vmem>>, vector<8x32xf32>
    %c0_1 = arith.constant 0 : index
    %c0_2 = arith.constant 0 : index
    %1 = vector.load %arg2[%c0_1, %c0_2] : memref<32x64xf32, #tpu.memory_space<vmem>>, vector<32x64xf32>
    %cst = arith.constant dense<0.000000e+00> : vector<8x64xf32>
    %2 = tpu.matmul %0, %1, %cst {dimension_numbers = #tpu.dot_dimension_numbers<[1], [0], [0], [1], [0, 0, 1, 1], [], []>} : vector<8x32xf32>, vector<32x64xf32>, vector<8x64xf32> -> vector<8x64xf32>
    %c0_3 = arith.constant 0 : index
    %c0_4 = arith.constant 0 : index
    %3 = vector.load %arg3[%c0_3, %c0_4] : memref<1x64xf32, #tpu.memory_space<vmem>>, vector<1x64xf32>
    %4 = vector.broadcast %3 : vector<1x64xf32> to vector<8x64xf32>
    %5 = arith.addf %2, %4 : vector<8x64xf32>
    %cst_5 = arith.constant 0.000000e+00 : f32
    %6 = vector.broadcast %cst_5 : f32 to vector<8x64xf32>
    %7 = arith.maximumf %5, %6 : vector<8x64xf32>
    %c0_6 = arith.constant 0 : index
    %c0_7 = arith.constant 0 : index
    %8 = vector.load %arg4[%c0_6, %c0_7] : memref<64x16xf32, #tpu.memory_space<vmem>>, vector<64x16xf32>
    %cst_8 = arith.constant dense<0.000000e+00> : vector<8x16xf32>
    %9 = tpu.matmul %7, %8, %cst_8 {dimension_numbers = #tpu.dot_dimension_numbers<[1], [0], [0], [1], [0, 0, 1, 1], [], []>} : vector<8x64xf32>, vector<64x16xf32>, vector<8x16xf32> -> vector<8x16xf32>
    %c0_9 = arith.constant 0 : index
    %c0_10 = arith.constant 0 : index
    %10 = vector.load %arg5[%c0_9, %c0_10] : memref<1x16xf32, #tpu.memory_space<vmem>>, vector<1x16xf32>
    %11 = vector.broadcast %10 : vector<1x16xf32> to vector<8x16xf32>
    %12 = arith.addf %9, %11 : vector<8x16xf32>
    %c0_11 = arith.constant 0 : index
    %c0_12 = arith.constant 0 : index
    %13 = vector.load %arg6[%c0_11, %c0_12] : memref<8x16xf32, #tpu.memory_space<vmem>>, vector<8x16xf32>
    tpu.vector_store %arg6[%c0_11, %c0_12], %12 {strides = array<i32>} : memref<8x16xf32, #tpu.memory_space<vmem>>, vector<8x16xf32>,
    return
  }
  func.func @transform_0(%arg0: i32) -> (i32, i32) {
    %c0_i32 = arith.constant 0 : i32
    %c0_i32_0 = arith.constant 0 : i32
    return %arg0, %c0_i32 : i32, i32
  }
  func.func @transform_1(%arg0: i32) -> (i32, i32) {
    %c0_i32 = arith.constant 0 : i32
    %c0_i32_0 = arith.constant 0 : i32
    %c0_i32_1 = arith.constant 0 : i32
    return %c0_i32, %c0_i32_0 : i32, i32
  }
  func.func @transform_2(%arg0: i32) -> (i32, i32) {
    %c0_i32 = arith.constant 0 : i32
    %c0_i32_0 = arith.constant 0 : i32
    %c0_i32_1 = arith.constant 0 : i32
    return %c0_i32, %c0_i32_0 : i32, i32
  }
  func.func @transform_3(%arg0: i32) -> (i32, i32) {
    %c0_i32 = arith.constant 0 : i32
    %c0_i32_0 = arith.constant 0 : i32
    %c0_i32_1 = arith.constant 0 : i32
    return %c0_i32, %c0_i32_0 : i32, i32
  }
  func.func @transform_4(%arg0: i32) -> (i32, i32) {
    %c0_i32 = arith.constant 0 : i32
    %c0_i32_0 = arith.constant 0 : i32
    %c0_i32_1 = arith.constant 0 : i32
    return %c0_i32, %c0_i32_0 : i32, i32
  }
  func.func @transform_5(%arg0: i32) -> (i32, i32) {
    %c0_i32 = arith.constant 0 : i32
    %c0_i32_0 = arith.constant 0 : i32
    return %arg0, %c0_i32 : i32, i32
  }
}

</mosaic_0001>

<bundles_post_ra>
// kernel: tpu_custom_call.1
= control target key start
LH: loop header
LB: loop body
LE: loop exit
PB: predicated region body
PF: predicated region fallthrough
CT: control target
= control target key end

     0   :  { %v286_v1 = vmov 0.0   ;;  %vm287_vm0 = vmmov 0   ;;  %s369_s0 = inlined_call_operand.vmem [shape: f32[8,32], index: 0, kind: input, shape index: {}]   ;;  %s370_s1 = inlined_call_operand.vmem [shape: f32[32,64], index: 1, kind: input, shape index: {}]   ;;  %s371_s2 = inlined_call_operand.vmem [shape: f32[1,64], index: 2, kind: input, shape index: {}]   ;;  %s372_s3 = inlined_call_operand.vmem [shape: f32[64,16], index: 3, kind: input, shape index: {}]   ;;  %s373_s4 = inlined_call_operand.vmem [shape: f32[1,16], index: 4, kind: input, shape index: {}]   ;;  %s374_s5 = inlined_call_operand.hbm [shape: f32[8,16], index: 5, kind: output, shape index: {}]  }
   0x1   :  { %v25_v0 = vld [vmem:[%s370_s1 + $0x18] sm:$0xff]  ;;  %231 = vmatprep.subr.mxu0 %v286_v1  ;;  %v24_v2 = vld [vmem:[%s370_s1 + $0x10] sm:$0xff]  ;;  %239 = vmatprep.mubr.msk.f32.mxu0 %vm287_vm0, %v286_v1  ;;  %v23_v5 = vld [vmem:[%s370_s1 + $0x8] sm:$0xff] }
   0x2   :  { %v115_v3 = vld [vmem:[%s372_s3 + $0x38] sm:$0xff]  ;;  %232 = vmatpush3.msra.mxu0 %v25_v0  ;;  %242 = vmatprep.subr.mxu1 %v286_v1  ;;  %v114_v4 = vld [vmem:[%s372_s3 + $0x30] sm:$0xff] }
   0x3   :  { %233 = vmatprep.subr.mxu0 %v286_v1  ;;  %243 = vmatpush3.msra.mxu1 %v115_v3 }
   0x4   :  { %10 = vsyncpa [#allocation3], 0  ;;  %234 = vmatpush3.msra.mxu0 %v24_v2  ;;  %244 = vmatprep.subr.mxu1 %v286_v1  ;;  %v113_v6 = vld [vmem:[%s372_s3 + $0x28] sm:$0xff]  ;;  %v22_v7 = vld [vmem:[%s370_s1] sm:$0xff]  ;;  %vm33_vm1 = vcmask 261120   ;;  %vm123_vm2 = vcmask 523264  }
   0x5   :  { %235 = vmatprep.subr.mxu0 %v286_v1  ;;  %245 = vmatpush3.msra.mxu1 %v114_v4  ;;  %v21_v8 = vld [vmem:[%s369_s0] sm:$0xff]  ;;  %v111_v10 = vld [vmem:[%s372_s3 + $0x18] sm:$0xff]  ;;  %v110_v11 = vld [vmem:[%s372_s3 + $0x10] sm:$0xff]  ;;  %s288_s21 = smov [#allocation2]   ;;  %vm197_vm3 = vcmask 130048  }
   0x6   :  { %236 = vmatpush3.msra.mxu0 %v23_v5  ;;  %246 = vmatprep.subr.mxu1 %v286_v1  ;;  %v112_v9 = vld [vmem:[%s372_s3 + $0x20] sm:$0xff]  ;;  %v109_v12 = vld [vmem:[%s372_s3 + $0x8] sm:$0xff]  ;;  %s205_s22 = sshll.u32 %s288_s21, 4  ;;  %s206_s22 = int_to_ptr.vmem [resolvable:$true] %s205_s22 }
   0x7   :  { %237 = vmatprep.subr.mxu0 %v286_v1  ;;  %247 = vmatpush3.msra.mxu1 %v113_v6  ;;  %v108_v13 = vld [vmem:[%s372_s3] sm:$0xff]  ;;  %s264_s3 = scalar_lea.vmem %s206_s22, 128  ;;  %p269_p1 = scmp.lt.s32.totalorder %s206_s22, %s206_s22 }
   0x8   :  { %238 = vmatpush3.msra.mxu0 %v22_v7  ;;  %248 = vmatprep.subr.mxu1 %v286_v1  ;;  %v213_v14 = vld [vmem:[%s371_s2] ss:$0 sm:$0xff]  ;;  %p265_p0 = scmp.ne.s32.totalorder %s206_s22, %s264_s3  ;;  %p270_p2 = scmp.lt.s32.totalorder %s264_s3, %s264_s3 }
   0x9   :  { %240 = vmatmul.mubr.msk.f32.vlgmr.msra.gmra.mxu0 %vm33_vm1, %v21_v8  ;;  %249 = vmatpush3.msra.mxu1 %v112_v9  ;;  %v215_v19 = vld [vmem:[%s373_s4] ss:$0 sm:$0xff] }
   0xa   :  { %250 = vmatprep.subr.mxu1 %v286_v1  ;;  %258 = vmatprep.mubr.msk.f32.mxu1 %vm287_vm0, %v286_v1  ;;  %p271_p3 = por %p270_p2, %p269_p1 }
   0xb   :  { %251 = vmatpush3.msra.mxu1 %v111_v10 }
   0xc   :  { %252 = vmatprep.subr.mxu1 %v286_v1  ;;  %p272_p4 = pnand %p271_p3, %p265_p0 }
   0xd   :  { %253 = vmatpush3.msra.mxu1 %v110_v11 }
   0xe   :  { %254 = vmatprep.subr.mxu1 %v286_v1 }
   0xf   :  { %255 = vmatpush3.msra.mxu1 %v109_v12 }
  0x10   :  { %256 = vmatprep.subr.mxu1 %v286_v1 }
  0x11   :  { %257 = vmatpush3.msra.mxu1 %v108_v13 }
  0xc9   :  { %v103_v15 = vpop.f32.mrf.mxu0 }
  0xca   :  { %v104_v16 = vadd.f32 %v213_v14, %v103_v15 }
  0xcb   :  { %v241_v17 = vpop.f32.mrf.mxu0 }
  0xcc   :  { %v107_v18 = vmax.f32 %v104_v16, 0.0 }
  0xce   :  { %259 = vmatmul.mubr.msk.f32.vlgmr.msra.gmra.mxu1 %vm123_vm2, %v107_v18 }
 0x18e   :  { %v193_v20 = vpop.f32.mrf.mxu1 }
 0x18f   :  { %v194_v21 = vadd.f32 %v215_v19, %v193_v20 }
 0x190   :  { %v260_v22 = vpop.f32.mrf.mxu1 }
 0x191   :  { %198 = vst.msk [vmem:[#allocation2] sm:$0xff] %vm197_vm3, %v194_v21 }
 0x192   :  { %275 = shalt.err (!%p272_p4)
}
 0x193   :  { %208 = dma.vmem_to_hbm [thread:$0]  %s206_s22, 128, %s374_s5, [#allocation3]  }
 0x194   :  { %284 = dma.done.wait [#allocation3], 128  }
 0x195   :  { %285 = vsyncadd [#allocation3], 4294967168 }
 0x196   :  { %212 = vsyncpa [#allocation3], 1 }

// kernel: tpu_custom_call.1
= control target key start
LH: loop header
LB: loop body
LE: loop exit
PB: predicated region body
PF: predicated region fallthrough
CT: control target
= control target key end

     0   :  { %v286_v1 = vmov 0.0   ;;  %vm287_vm0 = vmmov 0   ;;  %s369_s0 = inlined_call_operand.vmem [shape: f32[8,32], index: 0, kind: input, shape index: {}]   ;;  %s370_s1 = inlined_call_operand.vmem [shape: f32[32,64], index: 1, kind: input, shape index: {}]   ;;  %s371_s2 = inlined_call_operand.vmem [shape: f32[1,64], index: 2, kind: input, shape index: {}]   ;;  %s372_s3 = inlined_call_operand.vmem [shape: f32[64,16], index: 3, kind: input, shape index: {}]   ;;  %s373_s4 = inlined_call_operand.vmem [shape: f32[1,16], index: 4, kind: input, shape index: {}]   ;;  %s374_s5 = inlined_call_operand.hbm [shape: f32[8,16], index: 5, kind: output, shape index: {}]  }
   0x1   :  { %v25_v0 = vld [vmem:[%s370_s1 + $0x18] sm:$0xff]  ;;  %231 = vmatprep.subr.mxu0 %v286_v1  ;;  %v24_v2 = vld [vmem:[%s370_s1 + $0x10] sm:$0xff]  ;;  %239 = vmatprep.mubr.msk.f32.mxu0 %vm287_vm0, %v286_v1  ;;  %v23_v5 = vld [vmem:[%s370_s1 + $0x8] sm:$0xff] }
   0x2   :  { %v115_v3 = vld [vmem:[%s372_s3 + $0x38] sm:$0xff]  ;;  %232 = vmatpush3.msra.mxu0 %v25_v0  ;;  %242 = vmatprep.subr.mxu1 %v286_v1  ;;  %v114_v4 = vld [vmem:[%s372_s3 + $0x30] sm:$0xff] }
   0x3   :  { %233 = vmatprep.subr.mxu0 %v286_v1  ;;  %243 = vmatpush3.msra.mxu1 %v115_v3 }
   0x4   :  { %10 = vsyncpa [#allocation3], 0  ;;  %234 = vmatpush3.msra.mxu0 %v24_v2  ;;  %244 = vmatprep.subr.mxu1 %v286_v1  ;;  %v113_v6 = vld [vmem:[%s372_s3 + $0x28] sm:$0xff]  ;;  %v22_v7 = vld [vmem:[%s370_s1] sm:$0xff]  ;;  %vm33_vm1 = vcmask 261120   ;;  %vm123_vm2 = vcmask 523264  }
   0x5   :  { %235 = vmatprep.subr.mxu0 %v286_v1  ;;  %245 = vmatpush3.msra.mxu1 %v114_v4  ;;  %v21_v8 = vld [vmem:[%s369_s0] sm:$0xff]  ;;  %v111_v10 = vld [vmem:[%s372_s3 + $0x18] sm:$0xff]  ;;  %v110_v11 = vld [vmem:[%s372_s3 + $0x10] sm:$0xff]  ;;  %s288_s21 = smov [#allocation2]   ;;  %vm197_vm3 = vcmask 130048  }
   0x6   :  { %236 = vmatpush3.msra.mxu0 %v23_v5  ;;  %246 = vmatprep.subr.mxu1 %v286_v1  ;;  %v112_v9 = vld [vmem:[%s372_s3 + $0x20] sm:$0xff]  ;;  %v109_v12 = vld [vmem:[%s372_s3 + $0x8] sm:$0xff]  ;;  %s205_s22 = sshll.u32 %s288_s21, 4  ;;  %s206_s22 = int_to_ptr.vmem [resolvable:$true] %s205_s22 }
   0x7   :  { %237 = vmatprep.subr.mxu0 %v286_v1  ;;  %247 = vmatpush3.msra.mxu1 %v113_v6  ;;  %v108_v13 = vld [vmem:[%s372_s3] sm:$0xff]  ;;  %s264_s3 = scalar_lea.vmem %s206_s22, 128  ;;  %p269_p1 = scmp.lt.s32.totalorder %s206_s22, %s206_s22 }
   0x8   :  { %238 = vmatpush3.msra.mxu0 %v22_v7  ;;  %248 = vmatprep.subr.mxu1 %v286_v1  ;;  %v213_v14 = vld [vmem:[%s371_s2] ss:$0 sm:$0xff]  ;;  %p265_p0 = scmp.ne.s32.totalorder %s206_s22, %s264_s3  ;;  %p270_p2 = scmp.lt.s32.totalorder %s264_s3, %s264_s3 }
   0x9   :  { %240 = vmatmul.mubr.msk.f32.vlgmr.msra.gmra.mxu0 %vm33_vm1, %v21_v8  ;;  %249 = vmatpush3.msra.mxu1 %v112_v9  ;;  %v215_v19 = vld [vmem:[%s373_s4] ss:$0 sm:$0xff] }
   0xa   :  { %250 = vmatprep.subr.mxu1 %v286_v1  ;;  %258 = vmatprep.mubr.msk.f32.mxu1 %vm287_vm0, %v286_v1  ;;  %p271_p3 = por %p270_p2, %p269_p1 }
   0xb   :  { %251 = vmatpush3.msra.mxu1 %v111_v10 }
   0xc   :  { %252 = vmatprep.subr.mxu1 %v286_v1  ;;  %p272_p4 = pnand %p271_p3, %p265_p0 }
   0xd   :  { %253 = vmatpush3.msra.mxu1 %v110_v11 }
   0xe   :  { %254 = vmatprep.subr.mxu1 %v286_v1 }
   0xf   :  { %255 = vmatpush3.msra.mxu1 %v109_v12 }
  0x10   :  { %256 = vmatprep.subr.mxu1 %v286_v1 }
  0x11   :  { %257 = vmatpush3.msra.mxu1 %v108_v13 }
  0xc9   :  { %v103_v15 = vpop.f32.mrf.mxu0 }
  0xca   :  { %v104_v16 = vadd.f32 %v213_v14, %v103_v15 }
  0xcb   :  { %v241_v17 = vpop.f32.mrf.mxu0 }
  0xcc   :  { %v107_v18 = vmax.f32 %v104_v16, 0.0 }
  0xce   :  { %259 = vmatmul.mubr.msk.f32.vlgmr.msra.gmra.mxu1 %vm123_vm2, %v107_v18 }
 0x18e   :  { %v193_v20 = vpop.f32.mrf.mxu1 }
 0x18f   :  { %v194_v21 = vadd.f32 %v215_v19, %v193_v20 }
 0x190   :  { %v260_v22 = vpop.f32.mrf.mxu1 }
 0x191   :  { %198 = vst.msk [vmem:[#allocation2] sm:$0xff] %vm197_vm3, %v194_v21 }
 0x192   :  { %275 = shalt.err (!%p272_p4)
}
 0x193   :  { %208 = dma.vmem_to_hbm [thread:$0]  %s206_s22, 128, %s374_s5, [#allocation3]  }
 0x194   :  { %284 = dma.done.wait [#allocation3], 128  }
 0x195   :  { %285 = vsyncadd [#allocation3], 4294967168 }
 0x196   :  { %212 = vsyncpa [#allocation3], 1 }

</bundles_post_ra>
